<compile_context>
chip_gen: v6e
topology: v6e:2x2x1
jax: 0.10.0
libtpu: 0.0.40
codegen_flags: <defaults>
</compile_context>

<pallas_src>
import functools
import math

import jax
import jax.numpy as jnp
import numpy as np
from jax.experimental import pallas as pl
from jax.experimental.pallas import tpu as pltpu

# ----------------------------- small synthetic config -----------------------------
CROP_SIZE = 16           # analog of 336
PATCH_SIZE = 4           # analog of 14
IN_CHANNELS = 3
CLIP_HIDDEN = 128        # analog of 1024 (== image_dim_out); lane-aligned
CLIP_HEADS = 2
CLIP_HEAD_DIM = CLIP_HIDDEN // CLIP_HEADS
CLIP_INTERMEDIATE = 256  # analog of 4096; lane-aligned
NUM_CLIP_LAYERS = 1      # layer_idx=-2 on a 2-layer mini-CLIP -> keep 1 encoder layer
HIDDEN_SIZE = 128        # analog of 3072 (dim_projection); lane-aligned
LN_EPS = 1e-5

GRID = CROP_SIZE // PATCH_SIZE       # patches per side (analog of 24)
NUM_PATCHES = GRID * GRID            # analog of 576
SEQ_LEN = NUM_PATCHES + 1            # +CLS token (17; 577 at real scale)
L_PAD = ((SEQ_LEN + 7) // 8) * 8     # sublane-dense padded sequence (24; 640 suggested real)
IMAGE_DIM_OUT = CLIP_HIDDEN
HD_DIM = IMAGE_DIM_OUT * 4           # 4*C after 2x2 merge

PATCH_K_RAW = IN_CHANNELS * PATCH_SIZE * PATCH_SIZE   # 48 (588 at real scale)
PATCH_K_PAD = 128                                     # lane-aligned K for the MXU
assert PATCH_K_RAW + 1 <= PATCH_K_PAD
assert L_PAD % 8 == 0

CROP_BLOCK = 2                                  # crops per grid step (even -> v7x friendly)
MLP_I_CHUNK = min(CLIP_INTERMEDIATE, 1024)      # intermediate-axis tile of the MLP
assert CLIP_INTERMEDIATE % MLP_I_CHUNK == 0
PROJ_TM = 128                                   # img_projection M tile (256 also fine v6e/v7x)


def _vmem_limit_bytes():
    """Per-generation scoped-VMEM budget: 7/8 of physical, capped at 96 MiB."""
    phys = 128 * 1024 * 1024
    try:
        phys = int(pltpu.get_tpu_info().vmem_capacity_bytes)
    except Exception:
        pass
    return min(96 * 1024 * 1024, phys * 7 // 8)


VMEM_LIMIT_BYTES = _vmem_limit_bytes()


# --------------------------------- in-kernel helpers ---------------------------------
def _ln(x, g, b, eps=LN_EPS):
    """LayerNorm over the last axis, f32 statistics."""
    mean = jnp.mean(x, axis=-1, keepdims=True)
    c = x - mean
    var = jnp.mean(c * c, axis=-1, keepdims=True)
    return c * jax.lax.rsqrt(var + eps) * g + b


# ---------------------------------- Pallas kernels ----------------------------------
def _embed_kernel(x_ref, w_ref, pos_ref, g_ref, b_ref, o_ref):
    """Fused patch-embed matmul + CLS token + positional add + pre-LayerNorm (B crops/step).

    x_ref row 0 of each crop is a one-hot on column PATCH_K_RAW; the corresponding row of the
    padded patch weight holds the class embedding, so CLS comes out of the same MXU pass.
    Padded sequence rows / padded crops are all-zero and are sliced off in the wrapper.
    """
    B, L, K = x_ref.shape
    C = w_ref.shape[1]
    h = jnp.dot(x_ref[...].reshape(B * L, K), w_ref[...],
                preferred_element_type=jnp.float32)                 # bf16 x bf16 -> f32
    h = h.reshape(B, L, C) + pos_ref[...]                           # + positional (f32)
    o_ref[...] = _ln(h, g_ref[...], b_ref[...])


def _clip_layer_kernel(h_ref, wqkv_ref, bqkv_ref, wo_ref, vec_ref,
                       fc1w_ref, fc2w_ref, o_ref, acc_ref,
                       *, num_heads, head_dim, seq_real, i_chunk):
    """Entire CLIP encoder layer for CROP_BLOCK crops, hidden state resident in VMEM.

    vec_ref row layout: 0 ln1_g, 1 ln1_b, 2 attn out bias, 3 ln2_g, 4 ln2_b, 5 fc1_b, 6 fc2_b.
    Heads are processed by a rolled fori_loop; per-head weights are indexed on the leading
    (sublane-free) axis of the 3-D weight refs, accumulating into the acc_ref VMEM scratch.
    """
    f32, bf16 = jnp.float32, jnp.bfloat16
    B, L, C = h_ref.shape
    inter = fc1w_ref.shape[1]
    Dh = head_dim

    h2 = h_ref[...].reshape(B * L, C)                               # (B*L, C) f32 residual

    # ---- self-attention block (pre-LN; attention scale pre-folded into Wq/bq) ----
    x_bf = _ln(h2, vec_ref[0:1, :C], vec_ref[1:2, :C]).astype(bf16)

    # additive key-padding bias (-1e30 on padded key columns), hoisted out of the head loop
    kidx = jax.lax.broadcasted_iota(jnp.int32, (B, L, L), 2)
    key_bias = jnp.where(kidx < seq_real, 0.0, -1e30).astype(f32)

    acc_ref[...] = jnp.zeros_like(acc_ref)

    def _head(hd, carry):
        qkv = jnp.dot(x_bf, wqkv_ref[hd],
                      preferred_element_type=f32) + bqkv_ref[hd]    # (B*L, 3*Dh)
        q = qkv[:, :Dh].astype(bf16).reshape(B, L, Dh)
        k = qkv[:, Dh:2 * Dh].astype(bf16).reshape(B, L, Dh)
        v = qkv[:, 2 * Dh:3 * Dh].astype(bf16).reshape(B, L, Dh)
        s = jnp.einsum('bld,bmd->blm', q, k,
                       preferred_element_type=f32) + key_bias       # (B, L, L) f32
        s = s - jnp.max(s, axis=-1, keepdims=True)
        p = jnp.exp(s)
        # exp -> reciprocal scale (EUP) -> bf16 cast fused in one pass over the score tile
        p_bf = (p * pl.reciprocal(jnp.sum(p, axis=-1, keepdims=True),
                                  approx=True)).astype(bf16)
        a = jnp.einsum('blm,bmd->bld', p_bf, v, preferred_element_type=f32)
        # head-merge folded into the output projection: sum_h a_h @ Wo[h]
        acc_ref[...] += jnp.dot(a.reshape(B * L, Dh).astype(bf16), wo_ref[hd],
                                preferred_element_type=f32)
        return carry

    jax.lax.fori_loop(0, num_heads, _head, 0)
    h2 = h2 + acc_ref[...] + vec_ref[2:3, :C]

    # ---- MLP block (quick_gelu), tiled over the intermediate axis ----
    x_bf = _ln(h2, vec_ref[3:4, :C], vec_ref[4:5, :C]).astype(bf16)
    acc_ref[...] = jnp.zeros_like(acc_ref)
    for ci in range(0, inter, i_chunk):
        z = jnp.dot(x_bf, fc1w_ref[:, ci:ci + i_chunk],
                    preferred_element_type=f32) + vec_ref[5:6, ci:ci + i_chunk]
        z = z * jax.nn.sigmoid(1.702 * z)                           # quick_gelu (VPU/EUP, f32)
        acc_ref[...] += jnp.dot(z.astype(bf16), fc2w_ref[ci:ci + i_chunk, :],
                                preferred_element_type=f32)
    o_ref[...] = (h2 + acc_ref[...] + vec_ref[6:7, :C]).reshape(B, L, C)


def _img_projection_kernel(x_ref, w1_ref, b1_ref, w2_ref, b2_ref, o_ref):
    """img_projection = Linear(4*C, D) -> GELU (exact) -> Linear(D, D), fused & M-tiled."""
    f32, bf16 = jnp.float32, jnp.bfloat16
    h = jnp.dot(x_ref[...], w1_ref[...], preferred_element_type=f32) + b1_ref[...]
    h = jax.nn.gelu(h, approximate=False)          # torch nn.GELU() default: exact (erf)
    o_ref[...] = jnp.dot(h.astype(bf16), w2_ref[...],
                         preferred_element_type=f32) + b2_ref[...]


# ----------------------------------- kernel wrappers -----------------------------------
def pallas_clip_embed(x, patch_w, pos, g, b):
    Np = x.shape[0]
    B = CROP_BLOCK
    C = CLIP_HIDDEN
    return pl.pallas_call(
        _embed_kernel,
        out_shape=jax.ShapeDtypeStruct((Np, L_PAD, C), jnp.float32),
        grid=(Np // B,),
        in_specs=[
            pl.BlockSpec((B, L_PAD, PATCH_K_PAD), lambda i: (i, 0, 0)),
            pl.BlockSpec((PATCH_K_PAD, C), lambda i: (0, 0)),
            pl.BlockSpec((L_PAD, C), lambda i: (0, 0)),
            pl.BlockSpec((1, C), lambda i: (0, 0)),
            pl.BlockSpec((1, C), lambda i: (0, 0)),
        ],
        out_specs=pl.BlockSpec((B, L_PAD, C), lambda i: (i, 0, 0)),
        compiler_params=pltpu.CompilerParams(
            dimension_semantics=("parallel",),
            vmem_limit_bytes=VMEM_LIMIT_BYTES),
    )(x, patch_w, pos, g, b)


def pallas_clip_layer(h, lw):
    Np, L, C = h.shape
    B = CROP_BLOCK
    H = CLIP_HEADS
    Dh = CLIP_HEAD_DIM
    I = lw["fc1_w"].shape[1]
    W = lw["vec"].shape[1]
    kernel = functools.partial(_clip_layer_kernel,
                               num_heads=H, head_dim=Dh,
                               seq_real=SEQ_LEN, i_chunk=MLP_I_CHUNK)
    return pl.pallas_call(
        kernel,
        out_shape=jax.ShapeDtypeStruct((Np, L, C), jnp.float32),
        grid=(Np // B,),
        in_specs=[
            pl.BlockSpec((B, L, C), lambda i: (i, 0, 0)),        # hidden state (B crops/step)
            pl.BlockSpec((H, C, 3 * Dh), lambda i: (0, 0, 0)),   # head-major fused QKV (bf16)
            pl.BlockSpec((H, 1, 3 * Dh), lambda i: (0, 0, 0)),   # head-major QKV bias (f32)
            pl.BlockSpec((H, Dh, C), lambda i: (0, 0, 0)),       # head-major out-proj (bf16)
            pl.BlockSpec((8, W), lambda i: (0, 0)),              # packed LN/bias vectors (f32)
            pl.BlockSpec((C, I), lambda i: (0, 0)),              # fc1_w (bf16)
            pl.BlockSpec((I, C), lambda i: (0, 0)),              # fc2_w (bf16)
        ],
        out_specs=pl.BlockSpec((B, L, C), lambda i: (i, 0, 0)),
        scratch_shapes=[pltpu.VMEM((B * L, C), jnp.float32)],    # attn / MLP accumulator
        compiler_params=pltpu.CompilerParams(
            dimension_semantics=("parallel",),
            vmem_limit_bytes=VMEM_LIMIT_BYTES),
    )(h, lw["wqkv"], lw["bqkv"], lw["wo"], lw["vec"], lw["fc1_w"], lw["fc2_w"])


def pallas_img_projection(x, w1, b1, w2, b2, tm=PROJ_TM):
    M, K = x.shape
    D = w1.shape[1]
    m_pad = ((M + tm - 1) // tm) * tm
    if m_pad != M:
        x = jnp.pad(x, ((0, m_pad - M), (0, 0)))
    out = pl.pallas_call(
        _img_projection_kernel,
        out_shape=jax.ShapeDtypeStruct((m_pad, D), jnp.float32),
        grid=(m_pad // tm,),
        in_specs=[
            pl.BlockSpec((tm, K), lambda i: (i, 0)),
            pl.BlockSpec((K, D), lambda i: (0, 0)),
            pl.BlockSpec((1, D), lambda i: (0, 0)),
            pl.BlockSpec((D, D), lambda i: (0, 0)),
            pl.BlockSpec((1, D), lambda i: (0, 0)),
        ],
        out_specs=pl.BlockSpec((tm, D), lambda i: (i, 0)),
        compiler_params=pltpu.CompilerParams(
            dimension_semantics=("parallel",),
            vmem_limit_bytes=VMEM_LIMIT_BYTES),
    )(x, w1, b1, w2, b2)
    return out[:M]


# ------------------------------ mini CLIP vision model ------------------------------
def clip_vision_forward(pixel_values_flat, pp):
    """pixel_values_flat: (N, C_in, H, W) NCHW -> (N, NUM_PATCHES, CLIP_HIDDEN) patch feats."""
    N = pixel_values_flat.shape[0]
    P = PATCH_SIZE
    # Conv2d(3, C, kernel=P, stride=P, bias=False) as patchify (pure layout) + fused matmul.
    x = pixel_values_flat.reshape(N, IN_CHANNELS, GRID, P, GRID, P)
    x = jnp.transpose(x, (0, 2, 4, 1, 3, 5)).reshape(N, NUM_PATCHES, PATCH_K_RAW)
    x = jnp.pad(x, ((0, 0), (0, 0), (0, PATCH_K_PAD - PATCH_K_RAW)))    # lane-dense K
    # prepend the CLS one-hot row (column PATCH_K_RAW of patch_w holds class_embedding)
    cls_row = jnp.zeros((N, 1, PATCH_K_PAD), jnp.float32).at[:, 0, PATCH_K_RAW].set(1.0)
    x = jnp.concatenate([cls_row, x], axis=1)                            # (N, SEQ, K_PAD)
    # pad sequence to a sublane-dense length and crops to a multiple of CROP_BLOCK;
    # pre-cast to bf16 so the DMA into the embed kernel is half-width.
    n_pad = ((N + CROP_BLOCK - 1) // CROP_BLOCK) * CROP_BLOCK
    x = jnp.pad(x, ((0, n_pad - N), (0, L_PAD - SEQ_LEN), (0, 0))).astype(jnp.bfloat16)

    h = pallas_clip_embed(x, pp["patch_w"], pp["pos_embedding"],
                          pp["pre_ln_g"], pp["pre_ln_b"])
    # TODO(synk): at real scale (24 layers) carry h between layers in bf16 or keep all layers
    # resident in a single pallas_call (stacked weights, leading layer grid axis) to remove the
    # per-layer f32 HBM round trip (matters most on v5e).
    for lw in pp["layers"]:
        h = pallas_clip_layer(h, lw)

    # NOTE: the Phi3-V layer_idx=-2 path truncates the CLIP encoder and does NOT apply the
    # post-layernorm; type_feature == 'patch' drops the CLS token.  Slice off CLS + padding.
    return h[:N, 1:SEQ_LEN]


# --------------------------------- HD transform glue ---------------------------------
def reshape_hd_patches_2x2merge(image_features, h_crop, w_crop):
    N, L, C = image_features.shape
    H = int(math.isqrt(L))
    assert H * H == L and H % 2 == 0 and N % (h_crop * w_crop) == 0
    num_images = N // (h_crop * w_crop)
    x = image_features.reshape(N, H, H, C)
    x = x.reshape(N, H // 2, 2, H // 2, 2, C)
    x = jnp.transpose(x, (0, 1, 3, 2, 4, 5))
    x = x.reshape(N, -1, 4 * C)
    x = x.reshape(num_images, h_crop, w_crop, H // 2, H // 2, 4 * C)
    x = jnp.transpose(x, (0, 1, 3, 2, 4, 5))
    x = x.reshape(num_images, h_crop * H // 2, w_crop * H // 2, 4 * C)
    return x


def add_image_newline(image_features_hd, sub_GN):
    num_images, h, w, hid = image_features_hd.shape
    newline = jnp.broadcast_to(sub_GN, (num_images, h, 1, hid))
    return jnp.concatenate([image_features_hd, newline], axis=2).reshape(num_images, -1, hid)


def phi3_hd_image_embedding_forward(pixel_values, image_sizes, pp):
    """
    pixel_values: (num_images, num_crops, C_in, H, W) float32 (NCHW per crop)
    image_sizes:  host int array (num_images, 2) -> (h, w), multiples of CROP_SIZE
    returns: (num_images, num_img_tokens, HIDDEN_SIZE)
    """
    num_images, num_crops = pixel_values.shape[:2]
    flat = pixel_values.reshape(num_images * num_crops, *pixel_values.shape[2:])
    feats = clip_vision_forward(flat, pp)                        # (N, NUM_PATCHES, C)
    img_features = feats.reshape(num_images, num_crops, NUM_PATCHES, IMAGE_DIM_OUT)

    # hd_transform_order == 'sub_glb'
    global_features = img_features[:, 0]
    global_hd = reshape_hd_patches_2x2merge(global_features, 1, 1)
    global_hd_nl = add_image_newline(global_hd, pp["sub_GN"])

    # TODO(synk): the per-image host loop (variable crop counts) mirrors the PyTorch reference
    # (torch.stack of per-image sequences); a scalar-prefetch driven gather feeding the
    # projection kernel would remove the host-side retrace at real scale.
    all_image_embeddings = []
    for i, (h, w) in enumerate(np.asarray(image_sizes)):
        h_crop = int(h) // CROP_SIZE
        w_crop = int(w) // CROP_SIZE
        ncrops = h_crop * w_crop
        sub = img_features[i, 1:1 + ncrops]
        sub_hd = reshape_hd_patches_2x2merge(sub, h_crop, w_crop)
        sub_hd_nl = add_image_newline(sub_hd, pp["sub_GN"])
        all_image_embeddings.append(
            jnp.concatenate([sub_hd_nl[0], pp["glb_GN"][0], global_hd_nl[i]], axis=0))
    stacked = jnp.stack(all_image_embeddings)                    # (num_images, T, 4*C)

    ni, T, hd = stacked.shape
    proj = pallas_img_projection(stacked.reshape(ni * T, hd).astype(jnp.bfloat16),
                                 pp["proj_w1"], pp["proj_b1"],
                                 pp["proj_w2"], pp["proj_b2"])
    return proj.reshape(ni, T, HIDDEN_SIZE)


# ------------------------------- deterministic params -------------------------------
def init_params(key):
    def nrm(k, shape, scale=0.02):
        return scale * jax.random.normal(k, shape, dtype=jnp.float32)

    keys = iter(jax.random.split(key, 64))
    layers = []
    for _ in range(NUM_CLIP_LAYERS):
        layers.append(dict(
            ln1_g=jnp.ones((CLIP_HIDDEN,), jnp.float32) + nrm(next(keys), (CLIP_HIDDEN,)),
            ln1_b=nrm(next(keys), (CLIP_HIDDEN,)),
            wq=nrm(next(keys), (CLIP_HIDDEN, CLIP_HIDDEN)), bq=nrm(next(keys), (CLIP_HIDDEN,)),
            wk=nrm(next(keys), (CLIP_HIDDEN, CLIP_HIDDEN)), bk=nrm(next(keys), (CLIP_HIDDEN,)),
            wv=nrm(next(keys), (CLIP_HIDDEN, CLIP_HIDDEN)), bv=nrm(next(keys), (CLIP_HIDDEN,)),
            wo=nrm(next(keys), (CLIP_HIDDEN, CLIP_HIDDEN)), bo=nrm(next(keys), (CLIP_HIDDEN,)),
            ln2_g=jnp.ones((CLIP_HIDDEN,), jnp.float32) + nrm(next(keys), (CLIP_HIDDEN,)),
            ln2_b=nrm(next(keys), (CLIP_HIDDEN,)),
            fc1_w=nrm(next(keys), (CLIP_HIDDEN, CLIP_INTERMEDIATE)),
            fc1_b=nrm(next(keys), (CLIP_INTERMEDIATE,)),
            fc2_w=nrm(next(keys), (CLIP_INTERMEDIATE, CLIP_HIDDEN)),
            fc2_b=nrm(next(keys), (CLIP_HIDDEN,)),
        ))
    clip = dict(
        patch_w=nrm(next(keys), (PATCH_K_RAW, CLIP_HIDDEN)),   # conv weight, (cin,kh,kw) flat
        class_embedding=nrm(next(keys), (CLIP_HIDDEN,)),
        pos_embedding=nrm(next(keys), (SEQ_LEN, CLIP_HIDDEN)),
        pre_ln_g=jnp.ones((CLIP_HIDDEN,), jnp.float32) + nrm(next(keys), (CLIP_HIDDEN,)),
        pre_ln_b=nrm(next(keys), (CLIP_HIDDEN,)),
        layers=layers,
    )
    return dict(
        clip=clip,
        glb_GN=nrm(next(keys), (1, 1, HD_DIM)),
        sub_GN=nrm(next(keys), (1, 1, 1, HD_DIM)),
        proj_w1=nrm(next(keys), (HD_DIM, HIDDEN_SIZE)), proj_b1=nrm(next(keys), (HIDDEN_SIZE,)),
        proj_w2=nrm(next(keys), (HIDDEN_SIZE, HIDDEN_SIZE)), proj_b2=nrm(next(keys), (HIDDEN_SIZE,)),
    )


def prepare_params(p):
    """One-time weight prep: bf16 cast, head-major QKV/O layout, attention-scale folding,
    K padding, sequence padding of the positional table, packed per-layer vector operands."""
    scale = CLIP_HEAD_DIM ** -0.5
    clip = p["clip"]
    C, I, Dh = CLIP_HIDDEN, CLIP_INTERMEDIATE, CLIP_HEAD_DIM

    # Pad the patch conv weight K dim to 128; row PATCH_K_RAW carries the class embedding
    # so the CLS token is produced by the same matmul (its input row is a one-hot column).
    patch_w = jnp.zeros((PATCH_K_PAD, C), jnp.float32)
    patch_w = patch_w.at[:PATCH_K_RAW].set(clip["patch_w"])
    patch_w = patch_w.at[PATCH_K_RAW].set(clip["class_embedding"])

    pos = jnp.zeros((L_PAD, C), jnp.float32).at[:SEQ_LEN].set(clip["pos_embedding"])

    layers = []
    for lyr in clip["layers"]:
        wq, wk, wv = lyr["wq"] * scale, lyr["wk"], lyr["wv"]
        bq, bk, bv = lyr["bq"] * scale, lyr["bk"], lyr["bv"]
        wqkv = jnp.stack([
            jnp.concatenate([wq[:, h * Dh:(h + 1) * Dh],
                             wk[:, h * Dh:(h + 1) * Dh],
                             wv[:, h * Dh:(h + 1) * Dh]], axis=1)
            for h in range(CLIP_HEADS)])                              # (H, C, 3*Dh)
        bqkv = jnp.stack([
            jnp.concatenate([bq[h * Dh:(h + 1) * Dh],
                             bk[h * Dh:(h + 1) * Dh],
                             bv[h * Dh:(h + 1) * Dh]])[None, :]
            for h in range(CLIP_HEADS)])                              # (H, 1, 3*Dh)
        wo = jnp.stack([lyr["wo"][h * Dh:(h + 1) * Dh, :]
                        for h in range(CLIP_HEADS)])                  # (H, Dh, C)

        W = max(C, I)
        vec = jnp.zeros((8, W), jnp.float32)
        vec = vec.at[0, :C].set(lyr["ln1_g"])
        vec = vec.at[1, :C].set(lyr["ln1_b"])
        vec = vec.at[2, :C].set(lyr["bo"])
        vec = vec.at[3, :C].set(lyr["ln2_g"])
        vec = vec.at[4, :C].set(lyr["ln2_b"])
        vec = vec.at[5, :I].set(lyr["fc1_b"])
        vec = vec.at[6, :C].set(lyr["fc2_b"])

        layers.append(dict(
            wqkv=wqkv.astype(jnp.bfloat16), bqkv=bqkv,
            wo=wo.astype(jnp.bfloat16), vec=vec,
            fc1_w=lyr["fc1_w"].astype(jnp.bfloat16),
            fc2_w=lyr["fc2_w"].astype(jnp.bfloat16),
        ))
    return dict(
        patch_w=patch_w.astype(jnp.bfloat16),
        pos_embedding=pos,
        pre_ln_g=clip["pre_ln_g"].reshape(1, -1), pre_ln_b=clip["pre_ln_b"].reshape(1, -1),
        layers=layers,
        sub_GN=p["sub_GN"], glb_GN=p["glb_GN"],
        proj_w1=p["proj_w1"].astype(jnp.bfloat16), proj_b1=p["proj_b1"].reshape(1, -1),
        proj_w2=p["proj_w2"].astype(jnp.bfloat16), proj_b2=p["proj_b2"].reshape(1, -1),
    )


if __name__ == "__main__":
    key = jax.random.PRNGKey(0)
    pkey, ikey = jax.random.split(key)
    params = prepare_params(init_params(pkey))

    num_images = 1
    # image 0: 32x16 pixels -> h_crop=2, w_crop=1 -> 2 sub-crops + 1 global crop
    image_sizes = np.array([[2 * CROP_SIZE, 1 * CROP_SIZE]], dtype=np.int32)
    max_sub = int(np.max((image_sizes[:, 0] // CROP_SIZE) * (image_sizes[:, 1] // CROP_SIZE)))
    num_crops = 1 + max_sub
    pixel_values = jax.random.normal(
        ikey, (num_images, num_crops, IN_CHANNELS, CROP_SIZE, CROP_SIZE), dtype=jnp.float32)

    out = phi3_hd_image_embedding_forward(pixel_values, image_sizes, params)
    out = jax.block_until_ready(out)

    # sub: (2*2)*(1*2+1)=12 tokens, glb_GN: 1, global: 2*(2+1)=6 -> 19 tokens
    expected_tokens = 12 + 1 + 6
    assert out.shape == (num_images, expected_tokens, HIDDEN_SIZE), out.shape
    assert bool(jnp.all(jnp.isfinite(out)))
    print("KERNEL_OK")
</pallas_src>

<mosaic_0001>
module attributes {stable_mosaic.version = 11 : i64} {
  func.func @_embed_kernel(%arg0: i32, %arg1: memref<2x24x128xbf16, #tpu.memory_space<vmem>>, %arg2: memref<128x128xbf16, #tpu.memory_space<vmem>>, %arg3: memref<24x128xf32, #tpu.memory_space<vmem>>, %arg4: memref<1x128xf32, #tpu.memory_space<vmem>>, %arg5: memref<1x128xf32, #tpu.memory_space<vmem>>, %arg6: memref<2x24x128xf32, #tpu.memory_space<vmem>>) attributes {dimension_semantics = [#tpu.dimension_semantics<parallel>], iteration_bounds = array<i64: 2>, scalar_prefetch = 0 : i64, scratch_operands = 0 : i64, tpu.core_type = #tpu.core_type<tc>, window_params = [{transform_indices = @transform_0, window_bounds = array<i64: 2, 24, 128>}, {pipeline_mode = #tpu.pipeline_mode<synchronous>, transform_indices = @transform_1, window_bounds = array<i64: 128, 128>}, {pipeline_mode = #tpu.pipeline_mode<synchronous>, transform_indices = @transform_2, window_bounds = array<i64: 24, 128>}, {pipeline_mode = #tpu.pipeline_mode<synchronous>, transform_indices = @transform_3, window_bounds = array<i64: 1, 128>}, {pipeline_mode = #tpu.pipeline_mode<synchronous>, transform_indices = @transform_4, window_bounds = array<i64: 1, 128>}, {transform_indices = @transform_5, window_bounds = array<i64: 2, 24, 128>}]} {
    %c0 = arith.constant 0 : index
    %c0_0 = arith.constant 0 : index
    %c0_1 = arith.constant 0 : index
    %0 = vector.load %arg1[%c0, %c0_0, %c0_1] : memref<2x24x128xbf16, #tpu.memory_space<vmem>>, vector<2x24x128xbf16>
    %1 = vector.shape_cast %0 : vector<2x24x128xbf16> to vector<48x128xbf16>
    %c0_2 = arith.constant 0 : index
    %c0_3 = arith.constant 0 : index
    %2 = vector.load %arg2[%c0_2, %c0_3] : memref<128x128xbf16, #tpu.memory_space<vmem>>, vector<128x128xbf16>
    %cst = arith.constant dense<0.000000e+00> : vector<48x128xf32>
    %3 = tpu.matmul %1, %2, %cst {dimension_numbers = #tpu.dot_dimension_numbers<[1], [0], [0], [1], [0, 0, 1, 1], [], []>} : vector<48x128xbf16>, vector<128x128xbf16>, vector<48x128xf32> -> vector<48x128xf32>
    %4 = vector.shape_cast %3 : vector<48x128xf32> to vector<2x24x128xf32>
    %c0_4 = arith.constant 0 : index
    %c0_5 = arith.constant 0 : index
    %5 = vector.load %arg3[%c0_4, %c0_5] : memref<24x128xf32, #tpu.memory_space<vmem>>, vector<24x128xf32>
    %6 = vector.shape_cast %5 : vector<24x128xf32> to vector<1x24x128xf32>
    %7 = vector.broadcast %6 : vector<1x24x128xf32> to vector<2x24x128xf32>
    %8 = arith.addf %4, %7 : vector<2x24x128xf32>
    %c0_6 = arith.constant 0 : index
    %c0_7 = arith.constant 0 : index
    %9 = vector.load %arg4[%c0_6, %c0_7] : memref<1x128xf32, #tpu.memory_space<vmem>>, vector<1x128xf32>
    %c0_8 = arith.constant 0 : index
    %c0_9 = arith.constant 0 : index
    %10 = vector.load %arg5[%c0_8, %c0_9] : memref<1x128xf32, #tpu.memory_space<vmem>>, vector<1x128xf32>
    %cst_10 = arith.constant dense<0.000000e+00> : vector<2x24xf32>
    %11 = vector.multi_reduction <add>, %8, %cst_10 [2] : vector<2x24x128xf32> to vector<2x24xf32>
    %12 = vector.shape_cast %11 : vector<2x24xf32> to vector<2x24x1xf32>
    %cst_11 = arith.constant 1.280000e+02 : f32
    %13 = vector.broadcast %cst_11 : f32 to vector<2x24x1xf32>
    %14 = arith.divf %12, %13 : vector<2x24x1xf32>
    %15 = vector.broadcast %14 : vector<2x24x1xf32> to vector<2x24x128xf32>
    %16 = arith.subf %8, %15 : vector<2x24x128xf32>
    %17 = arith.mulf %16, %16 : vector<2x24x128xf32>
    %cst_12 = arith.constant dense<0.000000e+00> : vector<2x24xf32>
    %18 = vector.multi_reduction <add>, %17, %cst_12 [2] : vector<2x24x128xf32> to vector<2x24xf32>
    %19 = vector.shape_cast %18 : vector<2x24xf32> to vector<2x24x1xf32>
    %cst_13 = arith.constant 1.280000e+02 : f32
    %20 = vector.broadcast %cst_13 : f32 to vector<2x24x1xf32>
    %21 = arith.divf %19, %20 : vector<2x24x1xf32>
    %cst_14 = arith.constant 9.99999974E-6 : f32
    %22 = vector.broadcast %cst_14 : f32 to vector<2x24x1xf32>
    %23 = arith.addf %21, %22 : vector<2x24x1xf32>
    %24 = math.rsqrt %23 : vector<2x24x1xf32>
    %25 = vector.broadcast %24 : vector<2x24x1xf32> to vector<2x24x128xf32>
    %26 = arith.mulf %16, %25 : vector<2x24x128xf32>
    %27 = vector.shape_cast %9 : vector<1x128xf32> to vector<1x1x128xf32>
    %28 = vector.broadcast %27 : vector<1x1x128xf32> to vector<2x24x128xf32>
    %29 = arith.mulf %26, %28 : vector<2x24x128xf32>
    %30 = vector.shape_cast %10 : vector<1x128xf32> to vector<1x1x128xf32>
    %31 = vector.broadcast %30 : vector<1x1x128xf32> to vector<2x24x128xf32>
    %32 = arith.addf %29, %31 : vector<2x24x128xf32>
    %c0_15 = arith.constant 0 : index
    %c0_16 = arith.constant 0 : index
    %c0_17 = arith.constant 0 : index
    %33 = vector.load %arg6[%c0_15, %c0_16, %c0_17] : memref<2x24x128xf32, #tpu.memory_space<vmem>>, vector<2x24x128xf32>
    tpu.vector_store %arg6[%c0_15, %c0_16, %c0_17], %32 {strides = array<i32>} : memref<2x24x128xf32, #tpu.memory_space<vmem>>, vector<2x24x128xf32>,
    return
  }
  func.func @transform_0(%arg0: i32) -> (i32, i32, i32) {
    %c0_i32 = arith.constant 0 : i32
    %c0_i32_0 = arith.constant 0 : i32
    %c0_i32_1 = arith.constant 0 : i32
    return %arg0, %c0_i32, %c0_i32_0 : i32, i32, i32
  }
  func.func @transform_1(%arg0: i32) -> (i32, i32) {
    %c0_i32 = arith.constant 0 : i32
    %c0_i32_0 = arith.constant 0 : i32
    %c0_i32_1 = arith.constant 0 : i32
    return %c0_i32, %c0_i32_0 : i32, i32
  }
  func.func @transform_2(%arg0: i32) -> (i32, i32) {
    %c0_i32 = arith.constant 0 : i32
    %c0_i32_0 = arith.constant 0 : i32
    %c0_i32_1 = arith.constant 0 : i32
    return %c0_i32, %c0_i32_0 : i32, i32
  }
  func.func @transform_3(%arg0: i32) -> (i32, i32) {
    %c0_i32 = arith.constant 0 : i32
    %c0_i32_0 = arith.constant 0 : i32
    %c0_i32_1 = arith.constant 0 : i32
    return %c0_i32, %c0_i32_0 : i32, i32
  }
  func.func @transform_4(%arg0: i32) -> (i32, i32) {
    %c0_i32 = arith.constant 0 : i32
    %c0_i32_0 = arith.constant 0 : i32
    %c0_i32_1 = arith.constant 0 : i32
    return %c0_i32, %c0_i32_0 : i32, i32
  }
  func.func @transform_5(%arg0: i32) -> (i32, i32, i32) {
    %c0_i32 = arith.constant 0 : i32
    %c0_i32_0 = arith.constant 0 : i32
    %c0_i32_1 = arith.constant 0 : i32
    return %arg0, %c0_i32, %c0_i32_0 : i32, i32, i32
  }
}

</mosaic_0001>

<bundles_post_ra>
// kernel: tpu_custom_call.1
= control target key start
LH: loop header
LB: loop body
LE: loop exit
PB: predicated region body
PF: predicated region fallthrough
CT: control target
= control target key end

     0   :  { %10 = vsyncpa [#allocation3], 0  ;;  %s1224_s0 = inlined_call_operand.hbm [shape: bf16[4,24,128], index: 0, kind: input, shape index: {}]   ;;  %s1225_s1 = inlined_call_operand.hbm [shape: bf16[128,128], index: 1, kind: input, shape index: {}]   ;;  %s1226_s2 = inlined_call_operand.hbm [shape: f32[24,128], index: 2, kind: input, shape index: {}]   ;;  %s1227_s3 = inlined_call_operand.vmem [shape: f32[1,128], index: 3, kind: input, shape index: {}]   ;;  %s1228_s4 = inlined_call_operand.vmem [shape: f32[1,128], index: 4, kind: input, shape index: {}]   ;;  %s1229_s5 = inlined_call_operand.hbm [shape: f32[4,24,128], index: 5, kind: output, shape index: {}]  }
   0x1   :  { %12 = vsyncpa [#allocation3 + $0x1], 0 }
   0x2   :  { %13 = vsyncpa [#allocation6], 0 }
   0x3   :  { %14 = vsyncpa [#allocation4], 0 }
   0x4   :  { %16 = vsyncpa [#allocation4 + $0x1], 0  ;;  %s1015_s18 = smov 0   ;;  %s1017_s19 = smov 0  }
   0x5   :  { %s1019_s20 = smov 0   ;;  %s1021_s21 = smov 0  }
   0x6 LB: > { %s1036_s22 = sadd.s32 4294967295, %s971_s21   ;;  %s636_s23 = sadd.s32 4294967294, %s971_s21   ;;  %s971_s21 = sphi %s1021_s21, %s1252_s21   ;;  %s967_s20 = sphi %s1019_s20, %s1251_s20   ;;  %s963_s19 = sphi %s1017_s19, %s1250_s19   ;;  %s959_s18 = sphi %s1015_s18, %s1249_s18  }
   0x7   : > { %p42_p0 = scmp.ne.s32.totalorder %s963_s19, %s959_s18  ;;  %p1231_p1 = scmp.eq.s32.totalorder %s1036_s22, 0 }
   0x8   : > { %p150_p2 = scmp.eq.s32.totalorder %s1036_s22, 1  ;;  %p156_p3 = scmp.eq.s32.totalorder %s636_s23, 1 }
   0x9   : > { %p1045_p4 = por %p1231_p1, %p42_p0  ;;  %p637_p5 = scmp.ge.s32.totalorder %s971_s21, 1 }
   0xa   : > { %p1050_p6 = por %p156_p3, %p42_p0  ;;  %p163_p7 = scmp.lt.s32.totalorder %s971_s21, 3 }
   0xb   : > { %s1235_s24 = scalar_select %p1045_p4, 1, 0 }
   0xc   : > { %s1236_s25 = scalar_select %p1050_p6, 1, 0 }
   0xd   : > { %p1055_p8 = pnand %p637_p5, %p163_p7  ;;  %s973_s27 = smov [#allocation5]  }
   0xe   : > { %s175_s28 = sshll.u32 %s973_s27, 4  ;;  %s974_s30 = smov [#allocation7]   ;;  %s176_s28 = int_to_ptr.vmem [resolvable:$true] %s175_s28 }
   0xf   : > { %s1237_s26 = scalar_select %p1055_p8, 1, 0 }
  0x10   : > { %p737_p9 = pneg %p1055_p8  ;;  %s188_s6 = sshll.u32 %s974_s30, 4  ;;  %s189_s6 = int_to_ptr.vmem [resolvable:$true] %s188_s6 }
  0x11   : > { %s834_s7 = scalar_lea.vmem %s176_s28, 1024  ;;  %p842_p5 = scmp.lt.s32.totalorder %s176_s28, %s176_s28 }
  0x12   : > { %p1064_p11 = pnand %p737_p9, %p1231_p1  ;;  %p835_p13 = scmp.ne.s32.totalorder %s176_s28, %s834_s7 }
  0x13   : > { %p843_p7 = scmp.lt.s32.totalorder %s834_s7, %s834_s7 }
  0x14   : > { %p825_p12 = pneg %p1064_p11 }
  0x15   : > { %p844_p10 = por %p843_p7, %p842_p5 }
  0x16   : > { %p837_p0 = pnand %p835_p13, %p825_p12 }
  0x18   : > { %p838_p3 = pneg %p837_p0 }
  0x1a   : > { %p845_p9 = pnand %p844_p10, %p838_p3 }
  0x1c   : > { %848 = shalt.err (!%p845_p9)
}
  0x1d   : > { %s1230_s8 = smov 64   ;;  %s976_s9 = smov 4  }
  0x1e   : > { %740 = dma.hbm_to_vmem [thread:$0]  (!%p1064_p11), %s1225_s1, 1024, %s176_s28, [#allocation6], %s1230_s8, %s1230_s8, %s976_s9  }
  0x1f   : > { %s860_s12 = scalar_lea.vmem %s189_s6, 384  ;;  %p868_p10 = scmp.lt.s32.totalorder %s189_s6, %s189_s6 }
  0x20   : > { %p861_p13 = scmp.ne.s32.totalorder %s189_s6, %s860_s12  ;;  %p869_p3 = scmp.lt.s32.totalorder %s860_s12, %s860_s12 }
  0x22   : > { %p863_p0 = pnand %p861_p13, %p825_p12  ;;  %p870_p7 = por %p869_p3, %p868_p10 }
  0x24   : > { %p864_p5 = pneg %p863_p0 }
  0x26   : > { %p871_p9 = pnand %p870_p7, %p864_p5 }
  0x28   : > { %874 = shalt.err (!%p871_p9)
}
  0x29   : > { %s977_s13 = smov 128   ;;  %s978_s14 = smov 8  }
  0x2a   : > { %743 = dma.hbm_to_vmem [thread:$0]  (!%p1064_p11), %s1226_s2, 384, %s189_s6, [#allocation6], %s977_s13, %s977_s13, %s978_s14  }
  0x2b   : > { %s1090_s17 = sadd.s32 1, %s971_s21   ;;  %s29_s27 = sadd.s32 1, %s967_s20 }
  0x2c   : > { %s26_s23 = ssub.s32 %s971_s21, %s1090_s17  ;;  %p36_p13 = scmp.ne.s32.totalorder %s967_s20, %s963_s19 }
  0x2d   : > { %p27_p12 = scmp.eq.s32.totalorder %s26_s23, 0  ;;  %p37_p0 = scmp.eq.s32.totalorder %s971_s21, 0 }
  0x2e   : > { %p1103_p10 = por %p150_p2, %p36_p13  ;;  %p754_p3 = scmp.lt.s32.totalorder %s971_s21, 2 }
  0x2f   : > { %s1099_s28 = scalar_select %p27_p12, %s967_s20, %s29_s27  }
  0x30   : > { %p38_p5 = por %p37_p0, %p36_p13  ;;  %s208_s29 = sand.u32 1, %s967_s20  }
  0x31   : > { %s1239_s30 = scalar_select %p1103_p10, 1, 0 }
  0x32   : > { %s720_s7 = smul.u32 24, %s208_s29  ;;  %p1110_p11 = pnand %p754_p3, %p38_p5 }
  0x33   : > { %s721_s6 = smul.u32 384, %s971_s21  ;;  %s1121_s16 = scalar_lea.sflag [#allocation3], %s208_s29 }
  0x34   : > { %s212_s14 = scalar_lea.vmem [#allocation2], %s720_s7  ;;  %p877_p7 = pneg %p1110_p11 }
  0x35   : > { %s1117_s13 = scalar_lea.hbm %s1224_s0, %s721_s6  ;;  %s220_s15 = sshll.u32 %s212_s14, 4  ;;  %s1119_s15 = int_to_ptr.vmem [resolvable:$true] %s220_s15 }
  0x36   : > { %s875_s23 = scalar_lea.hbm %s1117_s13, 384  ;;  %s880_s6 = scalar_lea.hbm %s1224_s0, 768 }
  0x37   : > { %p876_p2 = scmp.ne.s32.totalorder %s1117_s13, %s875_s23  ;;  %p881_p13 = scmp.lt.s32.totalorder %s1117_s13, %s1224_s0 }
  0x38   : > { %p882_p0 = scmp.lt.s32.totalorder %s880_s6, %s875_s23 }
  0x39   : > { %p878_p9 = pnand %p877_p7, %p876_p2 }
  0x3a   : > { %p883_p5 = por %p882_p0, %p881_p13 }
  0x3b   : > { %p879_p12 = pneg %p878_p9 }
  0x3d   : > { %p884_p3 = pnand %p883_p5, %p879_p12 }
  0x3f   : > { %887 = shalt.err (!%p884_p3)
}
  0x40   : > { %s888_s29 = scalar_lea.vmem %s1119_s15, 384  ;;  %s979_s7 = smov [#allocation2]  }
  0x41   : > { %p889_p1 = scmp.ne.s32.totalorder %s1119_s15, %s888_s29  ;;  %s893_s14 = sshll.u32 %s979_s7, 4  ;;  %s894_s14 = int_to_ptr.vmem [resolvable:$false] %s893_s14 }
  0x42   : > { %s895_s27 = scalar_lea.vmem %s894_s14, 768  ;;  %p896_p9 = scmp.lt.s32.totalorder %s1119_s15, %s894_s14 }
  0x43   : > { %p891_p6 = pnand %p889_p1, %p877_p7  ;;  %p897_p10 = scmp.lt.s32.totalorder %s895_s27, %s888_s29 }
  0x45   : > { %p892_p2 = pneg %p891_p6  ;;  %p898_p4 = por %p897_p10, %p896_p9 }
  0x47   : > { %p899_p8 = pnand %p898_p4, %p892_p2 }
  0x49   : > { %902 = shalt.err (!%p899_p8)
}
  0x4a   : > { %s1241_s8 = smov 64   ;;  %p1242_p1 = scmp.ne.s32.totalorder %s1237_s26, 0 }
  0x4b   : > { %747 = dma.hbm_to_vmem [thread:$0]  (!%p1110_p11), %s1117_s13, 384, %s1119_s15, %s1121_s16, %s1241_s8, %s1241_s8, %s976_s9  }
  0x4c   : > { %232 = sbr.rel (%p1242_p1) target bundleno = 646 (0x286), region = 40  ;;  %s1148_s23 = sand.u32 (!%p1242_p1), 1, %s963_s19  }
  0x4d   : > { %s722_s11 = smul.u32 (!%p1242_p1), 24, %s1148_s23  ;;  %s235_s6 = scalar_lea.sflag (!%p1242_p1), [#allocation3], %s1148_s23 }
  0x4e   : > { %p1243_p4 = scmp.ne.s32.totalorder (!%p1242_p1), %s1235_s24, 0 }
  0x4f   : > { %s1152_s12 = scalar_lea.vmem (!%p1242_p1), [#allocation2], %s722_s11 }
  0x51   : > { %946 = dma.done.wait (%p1243_p4), %s235_s6, 384  }
  0x52   : > { %948 = vsyncadd (%p1243_p4), %s235_s6, 4294966912  ;;  %p1244_p6 = scmp.eq.s32.totalorder %s1036_s22, 0 }
  0x54   : > { %950 = dma.done.wait (%p1244_p6), [#allocation6], 1408   ;;  %p1245_p8 = pmov %p1244_p6 }
  0x55   : > { %v980_v0 = vmov 0.0   ;;  %vm981_vm0 = vmmov 0   ;;  %v800_v1 = vld [vmem:[#allocation5 + $0x38] sm:$0xff]   ;;  %v801_v2 = vld [vmem:[#allocation5 + $0x30] sm:$0xff]   ;;  %v802_v3 = vld [vmem:[#allocation5 + $0x28] sm:$0xff]   ;;  %s723_s24 = smul.u32 48, %s1148_s23 }
  0x56   : > { %952 = vsyncadd (%p1245_p8), [#allocation6], 4294965888  ;;  %676 = vmatprep.subr.bf16.mxu0 %v980_v0  ;;  %704 = vmatprep.subr.bf16.mxu1 %v980_v0  ;;  %v803_v4 = vld [vmem:[#allocation5 + $0x20] sm:$0xff]   ;;  %v804_v5 = vld [vmem:[#allocation5 + $0x18] sm:$0xff]   ;;  %s724_s16 = smul.u32 768, %s1036_s22  ;;  %s530_s22 = scalar_lea.sflag [#allocation4], %s1148_s23 }
  0x57   : > { %692 = vmatprep.mubr.msk.bf16.mxu0 %vm981_vm0, %v980_v0  ;;  %696 = vmatprep.mubr.msk.bf16.mxu1 %vm981_vm0, %v980_v0  ;;  %v805_v6 = vld [vmem:[#allocation5 + $0x10] sm:$0xff]   ;;  %v806_v7 = vld [vmem:[#allocation5 + $0x8] sm:$0xff]   ;;  %v807_v8 = vld [vmem:[#allocation5] sm:$0xff]   ;;  %s272_s15 = scalar_lea.vmem [#allocation8], %s723_s24  ;;  %p1246_p11 = scmp.ne.s32.totalorder %s1239_s30, 0 }
  0x58   : > { %677 = vmatpush3.bf16.msra.mxu0 %v800_v1  ;;  %712 = vmatpush3.bf16.msra.mxu1 %v800_v1  ;;  %v808_v9 = vld [vmem:[%s1152_s12] sm:$0xff]   ;;  %v809_v10 = vld [vmem:[%s1152_s12 + $0x8] sm:$0xff]   ;;  %v810_v11 = vld [vmem:[%s1152_s12 + $0x10] sm:$0xff]   ;;  %s544_s29 = sshll.u32 %s272_s15, 4  ;;  %s1179_s27 = scalar_lea.hbm %s1229_s5, %s724_s16  ;;  %s1181_s29 = int_to_ptr.vmem [resolvable:$true] %s544_s29 }
  0x59   : > { %678 = vmatprep.subr.bf16.mxu0 %v980_v0  ;;  %705 = vmatprep.subr.bf16.mxu1 %v980_v0  ;;  %v421_v12 = vld [vmem:[#allocation7] sm:$0xff]  ;;  %v423_v13 = vld [vmem:[#allocation7 + $0x10] sm:$0xff]  ;;  %v422_v20 = vld [vmem:[#allocation7 + $0x8] sm:$0xff]  ;;  %s903_s8 = scalar_lea.vmem %s1181_s29, 768  ;;  %s982_s11 = smov [#allocation8]  }
  0x5a   : > { %p904_p10 = scmp.ne.s32.totalorder %s1181_s29, %s903_s8  ;;  %s907_s6 = sshll.u32 %s982_s11, 4  ;;  %s908_s6 = int_to_ptr.vmem [resolvable:$false] %s907_s6 }
  0x5b   : > { %s909_s12 = scalar_lea.vmem %s908_s6, 1536  ;;  %p910_p13 = scmp.lt.s32.totalorder %s1181_s29, %s908_s6 }
  0x5c   : > { %679 = vmatpush3.bf16.msra.mxu0 %v801_v2  ;;  %713 = vmatpush3.bf16.msra.mxu1 %v801_v2  ;;  %p905_p7 = pnand %p904_p10, %p1246_p11  ;;  %p911_p0 = scmp.lt.s32.totalorder %s909_s12, %s903_s8 }
  0x5d   : > { %680 = vmatprep.subr.bf16.mxu0 %v980_v0  ;;  %706 = vmatprep.subr.bf16.mxu1 %v980_v0 }
  0x5e   : > { %p906_p12 = pneg %p905_p7  ;;  %p912_p5 = por %p911_p0, %p910_p13 }
  0x60   : > { %681 = vmatpush3.bf16.msra.mxu0 %v802_v3  ;;  %714 = vmatpush3.bf16.msra.mxu1 %v802_v3  ;;  %p913_p3 = pnand %p912_p5, %p906_p12 }
  0x61   : > { %682 = vmatprep.subr.bf16.mxu0 %v980_v0  ;;  %707 = vmatprep.subr.bf16.mxu1 %v980_v0 }
  0x64   : > { %683 = vmatpush3.bf16.msra.mxu0 %v803_v4  ;;  %715 = vmatpush3.bf16.msra.mxu1 %v803_v4 }
  0x65   : > { %684 = vmatprep.subr.bf16.mxu0 %v980_v0  ;;  %708 = vmatprep.subr.bf16.mxu1 %v980_v0 }
  0x68   : > { %685 = vmatpush3.bf16.msra.mxu0 %v804_v5  ;;  %716 = vmatpush3.bf16.msra.mxu1 %v804_v5 }
  0x69   : > { %686 = vmatprep.subr.bf16.mxu0 %v980_v0  ;;  %709 = vmatprep.subr.bf16.mxu1 %v980_v0 }
  0x6c   : > { %687 = vmatpush3.bf16.msra.mxu0 %v805_v6  ;;  %717 = vmatpush3.bf16.msra.mxu1 %v805_v6 }
  0x6d   : > { %688 = vmatprep.subr.bf16.mxu0 %v980_v0  ;;  %710 = vmatprep.subr.bf16.mxu1 %v980_v0 }
  0x70   : > { %689 = vmatpush3.bf16.msra.mxu0 %v806_v7  ;;  %718 = vmatpush3.bf16.msra.mxu1 %v806_v7 }
  0x71   : > { %690 = vmatprep.subr.bf16.mxu0 %v980_v0  ;;  %711 = vmatprep.subr.bf16.mxu1 %v980_v0 }
  0x74   : > { %691 = vmatpush3.bf16.msra.mxu0 %v807_v8  ;;  %719 = vmatpush3.bf16.msra.mxu1 %v807_v8 }
  0x77   : > { %693 = vmatmul.mubr.bf16.vlgmr.msra.gmra.mxu0 %v808_v9  ;;  %697 = vmatmul.mubr.bf16.vlgmr.msra.gmra.mxu1 %v809_v10 }
  0x78   : > { %700 = vmatprep.mubr.msk.bf16.mxu1 %vm981_vm0, %v980_v0 }
  0x7f   : > { %701 = vmatmul.mubr.bf16.gmra.mxu1 %v810_v11 }
 0x137   : > { %v398_v14 = vpop.f32.mrf.mxu0  ;;  %v406_v15 = vpop.f32.mrf.mxu1 }
 0x138   : > { %v424_v16 = vadd.f32 %v421_v12, %v398_v14  ;;  %v426_v17 = vadd.f32 %v423_v13, %v406_v15  ;;  %v659_v14 = vld [vmem:[%s1228_s4] ss:$0 sm:$0xff] }
 0x139   : > { %v694_v18 = vpop.f32.mrf.mxu0  ;;  %v698_v19 = vpop.f32.mrf.mxu1 }
 0x13a   : > { %436 = vadd.xlane.f32.xlu1 %v426_v17  ;;  %432 = vadd.xlane.f32.xlu0 %v424_v16 }
 0x13b   : > { %v401_v21 = vpop.f32.mrf.mxu0  ;;  %v409_v22 = vpop.f32.mrf.mxu1 }
 0x13c   : > { %v425_v23 = vadd.f32 %v422_v20, %v401_v21  ;;  %v427_v24 = vadd.f32 %v421_v12, %v409_v22  ;;  %v658_v12 = vld [vmem:[%s1227_s3] ss:$0 sm:$0xff] }
 0x13d   : > { %v695_v25 = vpop.f32.mrf.mxu0  ;;  %v699_v26 = vpop.f32.mrf.mxu1 }
 0x13e   : > { %438 = vadd.xlane.f32.xlu1 %v427_v24  ;;  %434 = vadd.xlane.f32.xlu0 %v425_v23 }
 0x13f   : > { %v414_v27 = vpop.f32.mrf.mxu1 }
 0x140   : > { %v428_v28 = vadd.f32 %v422_v20, %v414_v27 }
 0x141   : > { %v702_v29 = vpop.f32.mrf.mxu1 }
 0x142   : > { %440 = vadd.xlane.f32.xlu0 %v428_v28 }
 0x143   : > { %v417_v30 = vpop.f32.mrf.mxu1 }
 0x144   : > { %v429_v31 = vadd.f32 %v423_v13, %v417_v30 }
 0x145   : > { %v703_v32 = vpop.f32.mrf.mxu1 }
 0x146   : > { %442 = vadd.xlane.f32.xlu1 %v429_v31 }
 0x1c3   : > { %v437_v33 = vpop.xlane.xlu1 %436  ;;  %v433_v34 = vpop.xlane.xlu0 %432 }
 0x1c4   : > { %v447_v35 = vmul.f32 0.0078125, %v437_v33  ;;  %v445_v36 = vmul.f32 0.0078125, %v433_v34 }
 0x1c6   : > { %v451_v37 = vsub.f32 %v424_v16, %v445_v36  ;;  %v453_v40 = vsub.f32 %v426_v17, %v447_v35 }
 0x1c7   : > { %v439_v38 = vpop.xlane.xlu1 %438  ;;  %v435_v39 = vpop.xlane.xlu0 %434 }
 0x1c8   : > { %v448_v41 = vmul.f32 0.0078125, %v439_v38  ;;  %v446_v42 = vmul.f32 0.0078125, %v435_v39  ;;  %v457_v43 = vmul.f32 %v451_v37, %v451_v37  ;;  %v459_v48 = vmul.f32 %v453_v40, %v453_v40 }
 0x1ca   : > { %v452_v44 = vsub.f32 %v425_v23, %v446_v42  ;;  %463 = vadd.xlane.f32.xlu0 %v457_v43  ;;  %v454_v46 = vsub.f32 %v427_v24, %v448_v41 }
 0x1cb   : > { %v441_v45 = vpop.xlane.xlu0 %440 }
 0x1cc   : > { %v449_v47 = vmul.f32 0.0078125, %v441_v45  ;;  %v458_v49 = vmul.f32 %v452_v44, %v452_v44  ;;  %v460_v53 = vmul.f32 %v454_v46, %v454_v46 }
 0x1ce   : > { %v455_v50 = vsub.f32 %v428_v28, %v449_v47  ;;  %467 = vadd.xlane.f32.xlu0 %v459_v48  ;;  %465 = vadd.xlane.f32.xlu1 %v458_v49 }
 0x1cf   : > { %v443_v51 = vpop.xlane.xlu1 %442 }
 0x1d0   : > { %v450_v52 = vmul.f32 0.0078125, %v443_v51  ;;  %v461_v54 = vmul.f32 %v455_v50, %v455_v50 }
 0x1d2   : > { %v456_v55 = vsub.f32 %v429_v31, %v450_v52  ;;  %469 = vadd.xlane.f32.xlu1 %v460_v53  ;;  %471 = vadd.xlane.f32.xlu0 %v461_v54 }
 0x1d4   : > { %v462_v56 = vmul.f32 %v456_v55, %v456_v55 }
 0x1d6   : > { %473 = vadd.xlane.f32.xlu1 %v462_v56 }
 0x253   : > { %v464_v57 = vpop.xlane.xlu0 %463 }
 0x254   : > { %v475_v58 = vmul.f32 0.0078125, %v464_v57 }
 0x256   : > { %v481_v59 = vadd.f32 1e-05, %v475_v58 }
 0x257   : > { %v466_v60 = vpop.xlane.xlu1 %465  ;;  %v468_v61 = vpop.xlane.xlu0 %467 }
 0x258   : > { %811 = vrsqrt.f32 %v481_v59  ;;  %v476_v62 = vmul.f32 0.0078125, %v466_v60  ;;  %v477_v63 = vmul.f32 0.0078125, %v468_v61 }
 0x25a   : > { %v482_v0 = vadd.f32 1e-05, %v476_v62  ;;  %v483_v1 = vadd.f32 1e-05, %v477_v63 }
 0x25b   : > { %v470_v2 = vpop.xlane.xlu1 %469  ;;  %v472_v3 = vpop.xlane.xlu0 %471 }
 0x25c   : > { %813 = vrsqrt.f32 %v482_v0  ;;  %v478_v4 = vmul.f32 0.0078125, %v470_v2  ;;  %v479_v5 = vmul.f32 0.0078125, %v472_v3 }
 0x25d   : > { %815 = vrsqrt.f32 %v483_v1 }
 0x25e   : > { %v484_v6 = vadd.f32 1e-05, %v478_v4  ;;  %v485_v7 = vadd.f32 1e-05, %v479_v5 }
 0x25f   : > { %v474_v8 = vpop.xlane.xlu1 %473 }
 0x260   : > { %817 = vrsqrt.f32 %v484_v6  ;;  %v480_v9 = vmul.f32 0.0078125, %v474_v8 }
 0x261   : > { %819 = vrsqrt.f32 %v485_v7 }
 0x262   : > { %v486_v10 = vadd.f32 1e-05, %v480_v9 }
 0x264   : > { %821 = vrsqrt.f32 %v486_v10 }
 0x265   : > { %v812_v11 = vpop.eup %811 }
 0x266   : > { %v493_v13 = vmul.f32 %v812_v11, %v451_v37 }
 0x268   : > { %v505_v15 = vmul.f32 %v658_v12, %v493_v13 }
 0x269   : > { %v814_v16 = vpop.eup %813 }
 0x26a   : > { %v816_v17 = vpop.eup %815  ;;  %v517_v18 = vadd.f32 %v659_v14, %v505_v15  ;;  %v494_v19 = vmul.f32 %v814_v16, %v452_v44 }
 0x26b   : > { %v495_v20 = vmul.f32 %v816_v17, %v453_v40 }
 0x26c   : > { %523 = vst [vmem:[%s272_s15] sm:$0xff] %v517_v18  ;;  %v506_v21 = vmul.f32 %v658_v12, %v494_v19 }
 0x26d   : > { %v818_v22 = vpop.eup %817  ;;  %v507_v23 = vmul.f32 %v658_v12, %v495_v20 }
 0x26e   : > { %v820_v24 = vpop.eup %819  ;;  %v518_v25 = vadd.f32 %v659_v14, %v506_v21  ;;  %v496_v26 = vmul.f32 %v818_v22, %v454_v46 }
 0x26f   : > { %v519_v27 = vadd.f32 %v659_v14, %v507_v23  ;;  %v497_v28 = vmul.f32 %v820_v24, %v455_v50 }
 0x270   : > { %524 = vst [vmem:[%s272_s15 + $0x8] sm:$0xff] %v518_v25  ;;  %v508_v29 = vmul.f32 %v658_v12, %v496_v26 }
 0x271   : > { %v822_v30 = vpop.eup %821  ;;  %525 = vst [vmem:[%s272_s15 + $0x10] sm:$0xff] %v519_v27  ;;  %v509_v31 = vmul.f32 %v658_v12, %v497_v28 }
 0x272   : > { %v520_v32 = vadd.f32 %v659_v14, %v508_v29  ;;  %v498_v33 = vmul.f32 %v822_v30, %v456_v55 }
 0x273   : > { %v521_v34 = vadd.f32 %v659_v14, %v509_v31 }
 0x274   : > { %526 = vst [vmem:[%s272_s15 + $0x18] sm:$0xff] %v520_v32  ;;  %v510_v35 = vmul.f32 %v658_v12, %v498_v33 }
 0x275   : > { %527 = vst [vmem:[%s272_s15 + $0x20] sm:$0xff] %v521_v34 }
 0x276   : > { %v522_v36 = vadd.f32 %v659_v14, %v510_v35 }
 0x278   : > { %528 = vst [vmem:[%s272_s15 + $0x28] sm:$0xff] %v522_v36 }
 0x279   : > { %916 = shalt.err (!%p913_p3)
}
 0x27a   : > { %s917_s24 = scalar_lea.hbm %s1179_s27, 768  ;;  %s921_s10 = scalar_lea.hbm %s1229_s5, 1536 }
 0x27b   : > { %p918_p2 = scmp.ne.s32.totalorder %s1179_s27, %s917_s24  ;;  %p922_p4 = scmp.lt.s32.totalorder %s1179_s27, %s1229_s5 }
 0x27c   : > { %p923_p6 = scmp.lt.s32.totalorder %s921_s10, %s917_s24 }
 0x27d   : > { %p919_p9 = pnand %p918_p2, %p1246_p11 }
 0x27e   : > { %p924_p8 = por %p923_p6, %p922_p4 }
 0x27f   : > { %p920_p1 = pneg %p919_p9 }
 0x281   : > { %p925_p10 = pnand %p924_p8, %p920_p1 }
 0x283   : > { %928 = shalt.err (!%p925_p10)
}
 0x284   : > { %s983_s16 = smov 128   ;;  %s984_s7 = smov 8  }
 0x285   : > { %735 = dma.vmem_to_hbm [thread:$0]  (%p1246_p11), %s1181_s29, 768, %s1179_s27, %s530_s22, %s983_s16, %s983_s16, %s984_s7  }
 0x286 PF: > { %s559_s14 = sand.u32 1, %s959_s18   ;;  %p1247_p7 = scmp.ne.s32.totalorder %s1236_s25, 0 }
 0x287   : > { %p1248_p12 = scmp.ge.s32.totalorder %s971_s21, 2  ;;  %s560_s8 = scalar_lea.sflag [#allocation4], %s559_s14 }
 0x289   : > { %p749_p13 = pnand %p1248_p12, %p1247_p7 }
 0x28b   : > { %p750_p0 = pneg %p749_p13 }
 0x28d   : > { %954 = dma.done.wait (%p750_p0), %s560_s8, 768  }
 0x28e   : > { %956 = vsyncadd (%p750_p0), %s560_s8, 4294966528  ;;  %p19_p5 = scmp.ge.s32.totalorder %s1090_s17, 4   ;;  %s1249_s18 = smov %s963_s19 }
 0x28f   : > { %s1250_s19 = smov %s967_s20  ;;  %s1251_s20 = smov %s1099_s28 }
 0x290   : > { %s1252_s21 = smov %s1090_s17  ;;  %21 = sbr.rel (!%p19_p5) target bundleno = 6 (0x6), region = 93 }
 0x295   :  { %565 = vsyncpa [#allocation3], 1 }
 0x296   :  { %567 = vsyncpa [#allocation3 + $0x1], 1 }
 0x297   :  { %568 = vsyncpa [#allocation6], 1 }
 0x298   :  { %569 = vsyncpa [#allocation4], 1 }
 0x299   :  { %571 = vsyncpa [#allocation4 + $0x1], 1 }

</bundles_post_ra>
